<compile_context>
chip_gen: v7x
topology: tpu7x:2x2x1
jax: 0.10.0
libtpu: 0.0.40
codegen_flags: <defaults>
</compile_context>

<pallas_src>
import jax
import jax.numpy as jnp
from jax.experimental import pallas as pl
from jax.experimental.pallas import tpu as pltpu


def _constant_input_kernel(const_ref, o_ref):
    # const_ref: (1, Fp) VMEM tile of the learned constant (flattened C*H*W, padded)
    # o_ref:     (TB, Fp) VMEM tile of the output for this batch block
    # Broadcast co-issues on VPU/XLU slots with large slack; the binding
    # resource is the store slot / output DMA, so nothing else to optimize here.
    o_ref[...] = jnp.broadcast_to(const_ref[...], o_ref.shape).astype(o_ref.dtype)


def _round_up(x, m):
    return ((x + m - 1) // m) * m


def _vmem_capacity_bytes():
    try:
        cap = int(getattr(pltpu.get_tpu_info(), "vmem_capacity_bytes", 0))
        if cap > 0:
            return cap
    except Exception:
        pass
    return 64 * 1024 * 1024  # conservative fallback (v7x per-TC VMEM)


_SINGLE_BLOCK_MAX_BYTES = 512 * 1024   # below this, pipelining buys nothing
_MIN_PIPELINE_STEPS = 4                # overlap fill w/ writeback; >=2 TCs on v7x


def _choose_batch_block(batch, row_bytes, vmem_capacity):
    """Pick the batch-block size TB (multiple of 8, or == batch for one block)."""
    total_bytes = batch * row_bytes
    if total_bytes <= _SINGLE_BLOCK_MAX_BYTES:
        return batch  # single block: grid=(1,)
    # Generation-aware per-block budget: ~VMEM/8, clamped to [4 MiB, 12 MiB].
    budget = max(4 << 20, min(12 << 20, vmem_capacity // 8))
    tb_budget = max(8, (budget // row_bytes) // 8 * 8)
    # Force at least _MIN_PIPELINE_STEPS grid steps for DMA overlap / 2-TC sharding.
    tb_steps = _round_up(pl.cdiv(batch, _MIN_PIPELINE_STEPS), 8)
    return max(8, min(tb_budget, tb_steps))


def constant_input_forward(x, const_param, *, out_dtype=None):
    """Replicates const_param (1, C, H, W) across the batch dim of x.

    Output dtype follows const_param.dtype (PyTorch semantics) unless
    out_dtype is given (e.g. jnp.bfloat16 to halve HBM write traffic).
    """
    batch = x.shape[0]
    _, C, H, W = const_param.shape
    out_dtype = const_param.dtype if out_dtype is None else jnp.dtype(out_dtype)

    F = C * H * W
    Fp = _round_up(F, 128)  # lane-dense output: unmasked vst instead of vst.msk

    const_flat = const_param.reshape(1, F)
    if Fp != F:
        const_flat = jnp.pad(const_flat, ((0, 0), (0, Fp - F)))

    itemsize = jnp.dtype(out_dtype).itemsize
    row_bytes = Fp * itemsize
    vmem_capacity = _vmem_capacity_bytes()

    tb = _choose_batch_block(batch, row_bytes, vmem_capacity)
    grid = (pl.cdiv(batch, tb),)

    # Raise the scoped-VMEM limit so v5e's 16 MiB default never rejects the
    # double-buffered output block; stays well under physical VMEM everywhere
    # (v5e/v6e: 64 MiB of 128 MiB; v7x: 32 MiB of 64 MiB).
    vmem_limit = int(min(64 << 20, vmem_capacity // 2))

    bytes_accessed = (
        batch * Fp * itemsize                           # HBM writes (dominant)
        + Fp * jnp.dtype(const_param.dtype).itemsize    # constant read
    )

    out_flat = pl.pallas_call(
        _constant_input_kernel,
        out_shape=jax.ShapeDtypeStruct((batch, Fp), out_dtype),
        grid_spec=pltpu.PrefetchScalarGridSpec(
            num_scalar_prefetch=0,
            grid=grid,
            in_specs=[
                # Same constant block every grid step (broadcast source).
                # NOTE: pipeline_mode=pl.Buffered(1) would drop one redundant
                # ~4 KiB VMEM buffer; omitted for portability (negligible).
                pl.BlockSpec((1, Fp), lambda b: (0, 0)),
            ],
            out_specs=pl.BlockSpec((tb, Fp), lambda b: (b, 0)),
        ),
        compiler_params=pltpu.CompilerParams(
            # Batch grid axis is independent -> shard across v7x's 2 TCs.
            dimension_semantics=("parallel",),
            vmem_limit_bytes=vmem_limit,
        ),
        cost_estimate=pl.CostEstimate(
            flops=0, transcendentals=0, bytes_accessed=int(bytes_accessed)
        ),
    )(const_flat)

    if Fp != F:
        out_flat = out_flat[:, :F]
    return out_flat.reshape(batch, C, H, W)


class ConstantInput:
    """JAX/Pallas equivalent of the PyTorch ConstantInput module."""

    def __init__(self, channel, size=4, *, key):
        # nn.Parameter(torch.randn(1, channel, size, size)) -> standard normal
        self.input = jax.random.normal(
            key, (1, channel, size, size), dtype=jnp.float32
        )

    def __call__(self, x):
        return constant_input_forward(x, self.input)


if __name__ == "__main__":
    key = jax.random.PRNGKey(0)
    k_param, k_x = jax.random.split(key)

    channel, size = 4, 16
    batch = 2

    module = ConstantInput(channel, size=size, key=k_param)

    # The forward only uses x's batch dimension; give it a plausible input.
    x = jax.random.normal(k_x, (batch, channel, size, size), dtype=jnp.float32)

    out = jax.block_until_ready(module(x))
    ref = jnp.broadcast_to(module.input, (batch, channel, size, size))
    assert out.shape == (batch, channel, size, size)
    assert out.dtype == jnp.float32
    assert bool(jnp.array_equal(out, ref))

    # Extra check: ragged medium batch exercising the multi-step pipelined path
    # (4 grid steps, partial last block). x contents are never read.
    batch2 = 200
    x2 = jnp.zeros((batch2, channel, size, size), dtype=jnp.float32)
    out2 = jax.block_until_ready(module(x2))
    ref2 = jnp.broadcast_to(module.input, (batch2, channel, size, size))
    assert out2.shape == (batch2, channel, size, size)
    assert bool(jnp.array_equal(out2, ref2))

    print("KERNEL_OK")
</pallas_src>

<mosaic_0001>
module attributes {stable_mosaic.version = 11 : i64} {
  func.func @_constant_input_kernel(%arg0: i32, %arg1: memref<1x1024xf32, #tpu.memory_space<vmem>>, %arg2: memref<2x1024xf32, #tpu.memory_space<vmem>>) attributes {dimension_semantics = [#tpu.dimension_semantics<parallel>], iteration_bounds = array<i64: 1>, scalar_prefetch = 0 : i64, scratch_operands = 0 : i64, tpu.core_type = #tpu.core_type<tc>, window_params = [{pipeline_mode = #tpu.pipeline_mode<synchronous>, transform_indices = @transform_0, window_bounds = array<i64: 1, 1024>}, {transform_indices = @transform_1, window_bounds = array<i64: 2, 1024>}]} {
    %c0 = arith.constant 0 : index
    %c0_0 = arith.constant 0 : index
    %0 = vector.load %arg1[%c0, %c0_0] : memref<1x1024xf32, #tpu.memory_space<vmem>>, vector<1x1024xf32>
    %1 = vector.shape_cast %0 : vector<1x1024xf32> to vector<1x1024xf32>
    %2 = vector.broadcast %1 : vector<1x1024xf32> to vector<2x1024xf32>
    %c0_1 = arith.constant 0 : index
    %c0_2 = arith.constant 0 : index
    %3 = vector.load %arg2[%c0_1, %c0_2] : memref<2x1024xf32, #tpu.memory_space<vmem>>, vector<2x1024xf32>
    tpu.vector_store %arg2[%c0_1, %c0_2], %2 {strides = array<i32>} : memref<2x1024xf32, #tpu.memory_space<vmem>>, vector<2x1024xf32>,
    return
  }
  func.func @transform_0(%arg0: i32) -> (i32, i32) {
    %c0_i32 = arith.constant 0 : i32
    %c0_i32_0 = arith.constant 0 : i32
    %c0_i32_1 = arith.constant 0 : i32
    return %c0_i32, %c0_i32_0 : i32, i32
  }
  func.func @transform_1(%arg0: i32) -> (i32, i32) {
    %c0_i32 = arith.constant 0 : i32
    %c0_i32_0 = arith.constant 0 : i32
    return %arg0, %c0_i32 : i32, i32
  }
}

</mosaic_0001>

<bundles_post_ra>
// kernel: tpu_custom_call.1
= control target key start
LH: loop header
LB: loop body
LE: loop exit
PB: predicated region body
PF: predicated region fallthrough
CT: control target
= control target key end

     0   :  { %6 = vsyncpa [#allocation3], 0  ;;  %s196_s0 = inlined_call_operand.hbm [shape: f32[1,1024], index: 0, kind: input, shape index: {}]   ;;  %s197_s1 = inlined_call_operand.hbm [shape: f32[2,1024], index: 1, kind: output, shape index: {}]  }
   0x1   :  { %7 = vsyncpa [#allocation4], 0  ;;  %s159_s6 = smov [#allocation2]   ;;  %s111_s10 = scalar_lea.hbm %s196_s0, 128 }
   0x2   :  { %s14_s7 = sshll.u32 %s159_s6, 4  ;;  %p112_p0 = scmp.ne.s32.totalorder %s196_s0, %s111_s10  ;;  %s15_s7 = int_to_ptr.vmem [resolvable:$true] %s14_s7 }
   0x3   :  { %p115_p1 = scmp.lt.u32.totalorder %s111_s10, %s196_s0 }
   0x5   :  { %p117_p2 = pnand %p115_p1, %p112_p0 }
   0x7   :  { %120 = shalt.err (!%p117_p2)
}
   0x8   :  { %s121_s15 = scalar_lea.vmem %s15_s7, 128  ;;  %p126_p4 = scmp.lt.s32.totalorder %s15_s7, %s15_s7 }
   0x9   :  { %p122_p3 = scmp.ne.s32.totalorder %s15_s7, %s121_s15  ;;  %p127_p5 = scmp.lt.s32.totalorder %s121_s15, %s121_s15 }
   0xb   :  { %p128_p6 = por %p127_p5, %p126_p4 }
   0xd   :  { %p129_p7 = pnand %p128_p6, %p122_p3 }
   0xf   :  { %132 = shalt.err (!%p129_p7)
}
  0x10   :  { %17 = dma.hbm_to_vmem [thread:$0]  %s196_s0, 128, %s15_s7, [#allocation3]  }
  0x11   :  { %155 = dma.done.wait [#allocation3], 128  }
  0x12   :  { %156 = vsyncadd [#allocation3], 4294967168  ;;  %v23_v0 = vlaneseq  ;;  %v160_v1 = vmov 1983009808   ;;  %v21_v13 = vld [vmem:[#allocation2] sm:$0xff]  ;;  %s161_s0 = smov [#allocation5]  }
  0x13   :  { %v58_v2 = vunpack.c.l.s4 %v160_v1  ;;  %s99_s18 = sshll.u32 %s161_s0, 4  ;;  %s100_s18 = int_to_ptr.vmem [resolvable:$true] %s99_s18 }
  0x14   :  { %v24_v3 = vshrl.u32 %v23_v0, 7  ;;  %s133_s19 = scalar_lea.vmem %s100_s18, 256  ;;  %p138_p9 = scmp.lt.s32.totalorder %s100_s18, %s100_s18 }
  0x15   :  { %v59_v4 = vunpack.c.0.s8 %v58_v2  ;;  %p134_p8 = scmp.ne.s32.totalorder %s100_s18, %s133_s19  ;;  %p139_p10 = scmp.lt.s32.totalorder %s133_s19, %s133_s19 }
  0x16   :  { %v25_v5 = vsub.s32 0, %v24_v3  ;;  %v29_v6 = vsub.s32 1, %v24_v3  ;;  %v33_v7 = vsub.s32 2, %v24_v3  ;;  %v37_v8 = vsub.s32 3, %v24_v3 }
  0x17   :  { %v41_v9 = vsub.s32 4, %v24_v3  ;;  %v45_v10 = vsub.s32 5, %v24_v3  ;;  %v49_v11 = vsub.s32 6, %v24_v3  ;;  %v53_v12 = vsub.s32 7, %v24_v3  ;;  %p140_p11 = por %p139_p10, %p138_p9 }
  0x18   :  { %v62_v14 = vsub.s32 %v59_v4, %v24_v3  ;;  %v26_v15 = vrot.slane %v21_v13, %v25_v5  ;;  %v30_v16 = vrot.slane %v21_v13, %v29_v6  ;;  %v34_v17 = vrot.slane %v21_v13, %v33_v7 }
  0x19   :  { %v38_v18 = vrot.slane %v21_v13, %v37_v8  ;;  %v42_v19 = vrot.slane %v21_v13, %v41_v9  ;;  %v46_v20 = vrot.slane %v21_v13, %v45_v10  ;;  %v50_v21 = vrot.slane %v21_v13, %v49_v11  ;;  %p141_p12 = pnand %p140_p11, %p134_p8 }
  0x1a   :  { %v54_v22 = vrot.slane %v21_v13, %v53_v12  ;;  %v55_v23 = vcombine.low %v26_v15, %v30_v16 }
  0x1b   :  { %v56_v24 = vcombine.low %v34_v17, %v38_v18  ;;  %v72_v25 = vcombine.low %v42_v19, %v46_v20 }
  0x1c   :  { %v73_v26 = vcombine.low %v50_v21, %v54_v22  ;;  %v63_v27 = vrot.slane %v55_v23, %v62_v14 }
  0x1d   :  { %v70_v28 = vrot.slane %v56_v24, %v62_v14  ;;  %v80_v29 = vrot.slane %v72_v25, %v62_v14 }
  0x1e   :  { %v87_v30 = vrot.slane %v73_v26, %v62_v14 }
  0x1f   :  { %v71_v31 = vcombine.low %v63_v27, %v70_v28 }
  0x20   :  { %v88_v32 = vcombine.low %v80_v29, %v87_v30 }
  0x21   :  { %91 = vst [vmem:[#allocation5] sm:$0xff] %v71_v31 }
  0x22   :  { %92 = vst [vmem:[#allocation5 + $0x8] sm:$0xff] %v88_v32 }
  0x23   :  { %144 = shalt.err (!%p141_p12)
}
  0x24   :  { %s145_s22 = scalar_lea.hbm %s197_s1, 256 }
  0x25   :  { %p146_p13 = scmp.ne.s32.totalorder %s197_s1, %s145_s22  ;;  %p149_p0 = scmp.lt.u32.totalorder %s145_s22, %s197_s1 }
  0x27   :  { %p151_p1 = pnand %p149_p0, %p146_p13 }
  0x29   :  { %154 = shalt.err (!%p151_p1)
}
  0x2a   :  { %102 = dma.vmem_to_hbm [thread:$0]  %s100_s18, 256, %s197_s1, [#allocation4]  }
  0x2b   :  { %157 = dma.done.wait [#allocation4], 256  }
  0x2c   :  { %158 = vsyncadd [#allocation4], 4294967040 }
  0x2d   :  { %106 = vsyncpa [#allocation3], 1 }
  0x2e   :  { %107 = vsyncpa [#allocation4], 1 }

</bundles_post_ra>
